<compile_context>
chip_gen: v6e
topology: v6e:2x2x1
jax: 0.10.0
libtpu: 0.0.40
codegen_flags: <defaults>
</compile_context>

<pallas_src>
import jax
import jax.numpy as jnp
from jax.experimental import pallas as pl
from jax.experimental.pallas import tpu as pltpu


def _round_up(x, m):
    return (x + m - 1) // m * m


def _lane_tiling(n, max_tile=512):
    """Pad n to a multiple of 128 and pick a lane tile (128 <= tile <= max_tile)."""
    n_pad = _round_up(n, 128)
    if n_pad <= max_tile:
        return n_pad, n_pad
    n_pad = _round_up(n, max_tile)
    return n_pad, max_tile


# ----------------------------- Pallas kernels ------------------------------

def _conv_pool_relu_kernel(w_ref, b_ref, p_ref, o_ref):
    """Fused valid-conv (as matmul) + bias + 2x2 max-pool + ReLU.

    w_ref: (OC, K)     bf16, constant index_map -> stays resident across grid
    b_ref: (OC, 1)     f32,  constant index_map -> stays resident
    p_ref: (4, K, TN)  bf16 im2col patches; leading dim = 4 elems of 2x2 window
    o_ref: (OC, TN)    f32, lane-dense (N = batch*pooled-spatial on lanes)
    """
    w = w_ref[...]
    acc = jnp.dot(w, p_ref[0], preferred_element_type=jnp.float32)
    for d in range(1, 4):                         # max over the 2x2 pool window
        acc = jnp.maximum(
            acc, jnp.dot(w, p_ref[d], preferred_element_type=jnp.float32))
    # bias is constant across the window -> add once after the max (hoisted)
    o_ref[...] = jnp.maximum(acc + b_ref[...], 0.0)


def _head_kernel(x_ref, w1_ref, b1_ref, w2_ref, b2_ref, o_ref):
    """fc1 -> relu -> fc2 -> log_softmax; batch on lanes, classes on sublanes."""
    h = jnp.dot(w1_ref[...], x_ref[...],
                preferred_element_type=jnp.float32) + b1_ref[...]
    h = jnp.maximum(h, 0.0)
    # TODO(synk): training-mode F.dropout / Dropout2d not implemented (eval = identity).
    logits = jnp.dot(w2_ref[...], h.astype(w2_ref.dtype),
                     preferred_element_type=jnp.float32) + b2_ref[...]
    m = jnp.max(logits, axis=0, keepdims=True)    # reduce over the class axis
    z = logits - m
    lse = jnp.log(jnp.sum(jnp.exp(z), axis=0, keepdims=True))
    o_ref[...] = z - lse


_COMPILER_PARAMS = pltpu.CompilerParams(
    dimension_semantics=("parallel",),            # megacore shards the grid (v7x)
    vmem_limit_bytes=32 * 1024 * 1024,            # headroom below v7x 64 MiB VMEM
)


# ------------------------------ kernel wrappers -----------------------------

def conv_pool_relu(patches, w, b, *, max_tile=512):
    """patches (4, K, N) f32, w (OC, K) f32, b (OC, 1) f32 -> (OC, N) f32."""
    _, K, N = patches.shape
    OC = w.shape[0]
    n_pad, tile = _lane_tiling(N, max_tile)
    p = jnp.pad(patches, ((0, 0), (0, 0), (0, n_pad - N))).astype(jnp.bfloat16)
    out = pl.pallas_call(
        _conv_pool_relu_kernel,
        out_shape=jax.ShapeDtypeStruct((OC, n_pad), jnp.float32),
        grid=(n_pad // tile,),
        in_specs=[
            pl.BlockSpec((OC, K), lambda n: (0, 0)),        # resident weights
            pl.BlockSpec((OC, 1), lambda n: (0, 0)),        # resident bias
            pl.BlockSpec((4, K, tile), lambda n: (0, 0, n)),
        ],
        out_specs=pl.BlockSpec((OC, tile), lambda n: (0, n)),
        compiler_params=_COMPILER_PARAMS,
    )(w.astype(jnp.bfloat16), b, p)
    return out[:, :N]


def mlp_head(feats, w1, b1, w2, b2, *, max_tile=512):
    """feats (D, B) f32 -> log-probs (num_classes, B) f32."""
    D, B = feats.shape
    C = w2.shape[0]
    b_pad, tile = _lane_tiling(B, max_tile)
    x = jnp.pad(feats, ((0, 0), (0, b_pad - B))).astype(jnp.bfloat16)
    out = pl.pallas_call(
        _head_kernel,
        out_shape=jax.ShapeDtypeStruct((C, b_pad), jnp.float32),
        grid=(b_pad // tile,),
        in_specs=[
            pl.BlockSpec((D, tile), lambda n: (0, n)),
            pl.BlockSpec(w1.shape, lambda n: (0, 0)),
            pl.BlockSpec(b1.shape, lambda n: (0, 0)),
            pl.BlockSpec(w2.shape, lambda n: (0, 0)),
            pl.BlockSpec(b2.shape, lambda n: (0, 0)),
        ],
        out_specs=pl.BlockSpec((C, tile), lambda n: (0, n)),
        compiler_params=_COMPILER_PARAMS,
    )(x, w1.astype(jnp.bfloat16), b1, w2.astype(jnp.bfloat16), b2)
    return out[:, :B]


# ------------------------------- JAX glue -----------------------------------

def pool_conv_patches(x, k, *, channel_axis):
    """Gather im2col patches grouped by 2x2 pooling window (XLA data glue).

    x: (B, C, H, W) if channel_axis == 1, else (C, B, H, W).
    Returns (patches, (PH, PW)) with
      patches[dy*2+dx, c*k*k + kh*k + kw, b*PH*PW + ph*PW + pw]
        = x[b, c, 2*ph + dy + kh, 2*pw + dx + kw]
    """
    if channel_axis == 1:
        x = x.transpose(1, 0, 2, 3)                       # -> (C, B, H, W)
    C, B, H, W = x.shape
    OH, OW = H - k + 1, W - k + 1
    PH, PW = OH // 2, OW // 2
    win = jnp.arange(2)
    kk = jnp.arange(k)
    rows = win[:, None, None] + kk[None, :, None] + 2 * jnp.arange(PH)[None, None, :]
    cols = win[:, None, None] + kk[None, :, None] + 2 * jnp.arange(PW)[None, None, :]
    g = x[:, :, rows, :]                                  # (C, B, dy, kh, PH, W)
    g = g[..., cols]                                      # (C, B, dy, kh, PH, dx, kw, PW)
    g = g.transpose(2, 5, 0, 3, 6, 1, 4, 7)               # (dy, dx, C, kh, kw, B, PH, PW)
    return g.reshape(4, C * k * k, B * PH * PW), (PH, PW)


def cnn_mnist_forward(x, params):
    B = x.shape[0]

    # x = relu(max_pool2d(conv1(x), 2))  -- one fused kernel, (10, B*144) output
    p1, (PH1, PW1) = pool_conv_patches(x, 5, channel_axis=1)
    y1 = conv_pool_relu(p1, params["w1"], params["b1"])          # (10, B*144)
    y1 = y1.reshape(-1, B, PH1, PW1)                             # channel-major, no NCHW transpose

    # x = relu(max_pool2d(conv2_drop(conv2(x)), 2)); Dropout2d eval = identity
    p2, (PH2, PW2) = pool_conv_patches(y1, 5, channel_axis=0)
    y2 = conv_pool_relu(p2, params["w2"], params["b2"])          # (20, B*16)

    # x.view(-1, 320): feature index = c*16 + ph*4 + pw; batch stays on lanes
    OC2 = y2.shape[0]
    feats = (y2.reshape(OC2, B, PH2 * PW2)
               .transpose(0, 2, 1)
               .reshape(OC2 * PH2 * PW2, B))                     # (320, B)

    # fc1 -> relu -> (dropout: identity) -> fc2 -> log_softmax (fused kernel)
    out = mlp_head(feats, params["fc1_w"], params["fc1_b"],
                   params["fc2_w"], params["fc2_b"])             # (num_classes, B)
    return out.T                                                 # (B, num_classes)


def init_params(key, num_channels=1, num_classes=10):
    ks = jax.random.split(key, 8)

    def u(k, shape, fan_in):
        bound = 1.0 / jnp.sqrt(float(fan_in))
        return jax.random.uniform(k, shape, jnp.float32, -bound, bound)

    return {
        # conv weights flattened to (OC, C*kh*kw) -- matches the patch row order
        "w1": u(ks[0], (10, num_channels * 25), num_channels * 25),
        "b1": u(ks[1], (10, 1), num_channels * 25),
        "w2": u(ks[2], (20, 10 * 25), 10 * 25),
        "b2": u(ks[3], (20, 1), 10 * 25),
        # fc weights kept PyTorch-style (out, in); kernels compute W @ x
        "fc1_w": u(ks[4], (50, 320), 320),
        "fc1_b": u(ks[5], (50, 1), 320),
        "fc2_w": u(ks[6], (num_classes, 50), 50),
        "fc2_b": u(ks[7], (num_classes, 1), 50),
    }


def reference_forward(x, params):
    """Pure-JAX (XLA) reference mirroring the PyTorch module in eval mode."""
    def block(y, w_flat, b, oc):
        cin = y.shape[1]
        w = w_flat.reshape(oc, cin, 5, 5)
        y = jax.lax.conv_general_dilated(
            y, w, (1, 1), "VALID", dimension_numbers=("NCHW", "OIHW", "NCHW"))
        y = y + b.reshape(1, oc, 1, 1)
        Bq, Cq, Hq, Wq = y.shape
        y = y.reshape(Bq, Cq, Hq // 2, 2, Wq // 2, 2).max(axis=(3, 5))
        return jnp.maximum(y, 0.0)

    y = block(x, params["w1"], params["b1"], 10)
    y = block(y, params["w2"], params["b2"], 20)
    flat = y.reshape(y.shape[0], -1)
    h = jnp.maximum(flat @ params["fc1_w"].T + params["fc1_b"][:, 0], 0.0)
    logits = h @ params["fc2_w"].T + params["fc2_b"][:, 0]
    return jax.nn.log_softmax(logits, axis=-1)


if __name__ == "__main__":
    key = jax.random.PRNGKey(0)
    kx, kp = jax.random.split(key)

    B, num_channels, num_classes = 2, 1, 10
    # 28x28 spatial is required by the module (fc1 expects 20*4*4 = 320 features)
    x = jax.random.normal(kx, (B, num_channels, 28, 28), jnp.float32)
    params = init_params(kp, num_channels, num_classes)

    fwd = jax.jit(cnn_mnist_forward)
    out = jax.block_until_ready(fwd(x, params))
    assert out.shape == (B, num_classes)
    # log_softmax rows must exponentiate-sum to 1
    assert jnp.allclose(jnp.exp(out).sum(axis=1), 1.0, atol=1e-4)
    # numerically matches the pure-JAX reference (bf16 matmul operands)
    ref = jax.jit(reference_forward)(x, params)
    assert jnp.allclose(out, ref, atol=0.1)

    # exercise the multi-step ("parallel") lane grid with a larger batch
    x32 = jax.random.normal(kx, (32, num_channels, 28, 28), jnp.float32)
    out32 = jax.block_until_ready(fwd(x32, params))
    ref32 = jax.jit(reference_forward)(x32, params)
    assert out32.shape == (32, num_classes)
    assert jnp.allclose(out32, ref32, atol=0.1)

    print("KERNEL_OK")
</pallas_src>

<mosaic_0001>
module attributes {stable_mosaic.version = 11 : i64} {
  func.func @_conv_pool_relu_kernel(%arg0: i32, %arg1: memref<10x25xbf16, #tpu.memory_space<vmem>>, %arg2: memref<10x1xf32, #tpu.memory_space<vmem>>, %arg3: memref<4x25x384xbf16, #tpu.memory_space<vmem>>, %arg4: memref<10x384xf32, #tpu.memory_space<vmem>>) attributes {dimension_semantics = [#tpu.dimension_semantics<parallel>], iteration_bounds = array<i64: 1>, scalar_prefetch = 0 : i64, scratch_operands = 0 : i64, tpu.core_type = #tpu.core_type<tc>, window_params = [{pipeline_mode = #tpu.pipeline_mode<synchronous>, transform_indices = @transform_0, window_bounds = array<i64: 10, 25>}, {pipeline_mode = #tpu.pipeline_mode<synchronous>, transform_indices = @transform_1, window_bounds = array<i64: 10, 1>}, {transform_indices = @transform_2, window_bounds = array<i64: 4, 25, 384>}, {transform_indices = @transform_3, window_bounds = array<i64: 10, 384>}]} {
    %c0 = arith.constant 0 : index
    %c0_0 = arith.constant 0 : index
    %0 = vector.load %arg1[%c0, %c0_0] : memref<10x25xbf16, #tpu.memory_space<vmem>>, vector<10x25xbf16>
    %c0_1 = arith.constant 0 : index
    %c0_2 = arith.constant 0 : index
    %c0_3 = arith.constant 0 : index
    %1 = vector.load %arg3[%c0_1, %c0_2, %c0_3] : memref<4x25x384xbf16, #tpu.memory_space<vmem>>, vector<1x25x384xbf16>
    %2 = vector.shape_cast %1 : vector<1x25x384xbf16> to vector<25x384xbf16>
    %cst = arith.constant dense<0.000000e+00> : vector<10x384xf32>
    %3 = tpu.matmul %0, %2, %cst {dimension_numbers = #tpu.dot_dimension_numbers<[1], [0], [0], [1], [0, 0, 1, 1], [], []>} : vector<10x25xbf16>, vector<25x384xbf16>, vector<10x384xf32> -> vector<10x384xf32>
    %c1 = arith.constant 1 : index
    %c0_4 = arith.constant 0 : index
    %c0_5 = arith.constant 0 : index
    %4 = vector.load %arg3[%c1, %c0_4, %c0_5] : memref<4x25x384xbf16, #tpu.memory_space<vmem>>, vector<1x25x384xbf16>
    %5 = vector.shape_cast %4 : vector<1x25x384xbf16> to vector<25x384xbf16>
    %cst_6 = arith.constant dense<0.000000e+00> : vector<10x384xf32>
    %6 = tpu.matmul %0, %5, %cst_6 {dimension_numbers = #tpu.dot_dimension_numbers<[1], [0], [0], [1], [0, 0, 1, 1], [], []>} : vector<10x25xbf16>, vector<25x384xbf16>, vector<10x384xf32> -> vector<10x384xf32>
    %7 = arith.maximumf %3, %6 : vector<10x384xf32>
    %c2 = arith.constant 2 : index
    %c0_7 = arith.constant 0 : index
    %c0_8 = arith.constant 0 : index
    %8 = vector.load %arg3[%c2, %c0_7, %c0_8] : memref<4x25x384xbf16, #tpu.memory_space<vmem>>, vector<1x25x384xbf16>
    %9 = vector.shape_cast %8 : vector<1x25x384xbf16> to vector<25x384xbf16>
    %cst_9 = arith.constant dense<0.000000e+00> : vector<10x384xf32>
    %10 = tpu.matmul %0, %9, %cst_9 {dimension_numbers = #tpu.dot_dimension_numbers<[1], [0], [0], [1], [0, 0, 1, 1], [], []>} : vector<10x25xbf16>, vector<25x384xbf16>, vector<10x384xf32> -> vector<10x384xf32>
    %11 = arith.maximumf %7, %10 : vector<10x384xf32>
    %c3 = arith.constant 3 : index
    %c0_10 = arith.constant 0 : index
    %c0_11 = arith.constant 0 : index
    %12 = vector.load %arg3[%c3, %c0_10, %c0_11] : memref<4x25x384xbf16, #tpu.memory_space<vmem>>, vector<1x25x384xbf16>
    %13 = vector.shape_cast %12 : vector<1x25x384xbf16> to vector<25x384xbf16>
    %cst_12 = arith.constant dense<0.000000e+00> : vector<10x384xf32>
    %14 = tpu.matmul %0, %13, %cst_12 {dimension_numbers = #tpu.dot_dimension_numbers<[1], [0], [0], [1], [0, 0, 1, 1], [], []>} : vector<10x25xbf16>, vector<25x384xbf16>, vector<10x384xf32> -> vector<10x384xf32>
    %15 = arith.maximumf %11, %14 : vector<10x384xf32>
    %c0_13 = arith.constant 0 : index
    %c0_14 = arith.constant 0 : index
    %16 = vector.load %arg2[%c0_13, %c0_14] : memref<10x1xf32, #tpu.memory_space<vmem>>, vector<10x1xf32>
    %17 = vector.broadcast %16 : vector<10x1xf32> to vector<10x384xf32>
    %18 = arith.addf %15, %17 : vector<10x384xf32>
    %cst_15 = arith.constant 0.000000e+00 : f32
    %19 = vector.broadcast %cst_15 : f32 to vector<10x384xf32>
    %20 = arith.maximumf %18, %19 : vector<10x384xf32>
    %c0_16 = arith.constant 0 : index
    %c0_17 = arith.constant 0 : index
    %21 = vector.load %arg4[%c0_16, %c0_17] : memref<10x384xf32, #tpu.memory_space<vmem>>, vector<10x384xf32>
    tpu.vector_store %arg4[%c0_16, %c0_17], %20 {strides = array<i32>} : memref<10x384xf32, #tpu.memory_space<vmem>>, vector<10x384xf32>,
    return
  }
  func.func @transform_0(%arg0: i32) -> (i32, i32) {
    %c0_i32 = arith.constant 0 : i32
    %c0_i32_0 = arith.constant 0 : i32
    %c0_i32_1 = arith.constant 0 : i32
    return %c0_i32, %c0_i32_0 : i32, i32
  }
  func.func @transform_1(%arg0: i32) -> (i32, i32) {
    %c0_i32 = arith.constant 0 : i32
    %c0_i32_0 = arith.constant 0 : i32
    %c0_i32_1 = arith.constant 0 : i32
    return %c0_i32, %c0_i32_0 : i32, i32
  }
  func.func @transform_2(%arg0: i32) -> (i32, i32, i32) {
    %c0_i32 = arith.constant 0 : i32
    %c0_i32_0 = arith.constant 0 : i32
    %c0_i32_1 = arith.constant 0 : i32
    return %c0_i32, %c0_i32_0, %arg0 : i32, i32, i32
  }
  func.func @transform_3(%arg0: i32) -> (i32, i32) {
    %c0_i32 = arith.constant 0 : i32
    %c0_i32_0 = arith.constant 0 : i32
    return %c0_i32, %arg0 : i32, i32
  }
}

module attributes {stable_mosaic.version = 11 : i64} {
  func.func @_conv_pool_relu_kernel(%arg0: i32, %arg1: memref<20x250xbf16, #tpu.memory_space<vmem>>, %arg2: memref<20x1xf32, #tpu.memory_space<vmem>>, %arg3: memref<4x250x128xbf16, #tpu.memory_space<vmem>>, %arg4: memref<20x128xf32, #tpu.memory_space<vmem>>) attributes {dimension_semantics = [#tpu.dimension_semantics<parallel>], iteration_bounds = array<i64: 1>, scalar_prefetch = 0 : i64, scratch_operands = 0 : i64, tpu.core_type = #tpu.core_type<tc>, window_params = [{pipeline_mode = #tpu.pipeline_mode<synchronous>, transform_indices = @transform_0, window_bounds = array<i64: 20, 250>}, {pipeline_mode = #tpu.pipeline_mode<synchronous>, transform_indices = @transform_1, window_bounds = array<i64: 20, 1>}, {transform_indices = @transform_2, window_bounds = array<i64: 4, 250, 128>}, {transform_indices = @transform_3, window_bounds = array<i64: 20, 128>}]} {
    %c0 = arith.constant 0 : index
    %c0_0 = arith.constant 0 : index
    %0 = vector.load %arg1[%c0, %c0_0] : memref<20x250xbf16, #tpu.memory_space<vmem>>, vector<20x250xbf16>
    %c0_1 = arith.constant 0 : index
    %c0_2 = arith.constant 0 : index
    %c0_3 = arith.constant 0 : index
    %1 = vector.load %arg3[%c0_1, %c0_2, %c0_3] : memref<4x250x128xbf16, #tpu.memory_space<vmem>>, vector<1x250x128xbf16>
    %2 = vector.shape_cast %1 : vector<1x250x128xbf16> to vector<250x128xbf16>
    %cst = arith.constant dense<0.000000e+00> : vector<20x128xf32>
    %3 = tpu.matmul %0, %2, %cst {dimension_numbers = #tpu.dot_dimension_numbers<[1], [0], [0], [1], [0, 0, 1, 1], [], []>} : vector<20x250xbf16>, vector<250x128xbf16>, vector<20x128xf32> -> vector<20x128xf32>
    %c1 = arith.constant 1 : index
    %c0_4 = arith.constant 0 : index
    %c0_5 = arith.constant 0 : index
    %4 = vector.load %arg3[%c1, %c0_4, %c0_5] : memref<4x250x128xbf16, #tpu.memory_space<vmem>>, vector<1x250x128xbf16>
    %5 = vector.shape_cast %4 : vector<1x250x128xbf16> to vector<250x128xbf16>
    %cst_6 = arith.constant dense<0.000000e+00> : vector<20x128xf32>
    %6 = tpu.matmul %0, %5, %cst_6 {dimension_numbers = #tpu.dot_dimension_numbers<[1], [0], [0], [1], [0, 0, 1, 1], [], []>} : vector<20x250xbf16>, vector<250x128xbf16>, vector<20x128xf32> -> vector<20x128xf32>
    %7 = arith.maximumf %3, %6 : vector<20x128xf32>
    %c2 = arith.constant 2 : index
    %c0_7 = arith.constant 0 : index
    %c0_8 = arith.constant 0 : index
    %8 = vector.load %arg3[%c2, %c0_7, %c0_8] : memref<4x250x128xbf16, #tpu.memory_space<vmem>>, vector<1x250x128xbf16>
    %9 = vector.shape_cast %8 : vector<1x250x128xbf16> to vector<250x128xbf16>
    %cst_9 = arith.constant dense<0.000000e+00> : vector<20x128xf32>
    %10 = tpu.matmul %0, %9, %cst_9 {dimension_numbers = #tpu.dot_dimension_numbers<[1], [0], [0], [1], [0, 0, 1, 1], [], []>} : vector<20x250xbf16>, vector<250x128xbf16>, vector<20x128xf32> -> vector<20x128xf32>
    %11 = arith.maximumf %7, %10 : vector<20x128xf32>
    %c3 = arith.constant 3 : index
    %c0_10 = arith.constant 0 : index
    %c0_11 = arith.constant 0 : index
    %12 = vector.load %arg3[%c3, %c0_10, %c0_11] : memref<4x250x128xbf16, #tpu.memory_space<vmem>>, vector<1x250x128xbf16>
    %13 = vector.shape_cast %12 : vector<1x250x128xbf16> to vector<250x128xbf16>
    %cst_12 = arith.constant dense<0.000000e+00> : vector<20x128xf32>
    %14 = tpu.matmul %0, %13, %cst_12 {dimension_numbers = #tpu.dot_dimension_numbers<[1], [0], [0], [1], [0, 0, 1, 1], [], []>} : vector<20x250xbf16>, vector<250x128xbf16>, vector<20x128xf32> -> vector<20x128xf32>
    %15 = arith.maximumf %11, %14 : vector<20x128xf32>
    %c0_13 = arith.constant 0 : index
    %c0_14 = arith.constant 0 : index
    %16 = vector.load %arg2[%c0_13, %c0_14] : memref<20x1xf32, #tpu.memory_space<vmem>>, vector<20x1xf32>
    %17 = vector.broadcast %16 : vector<20x1xf32> to vector<20x128xf32>
    %18 = arith.addf %15, %17 : vector<20x128xf32>
    %cst_15 = arith.constant 0.000000e+00 : f32
    %19 = vector.broadcast %cst_15 : f32 to vector<20x128xf32>
    %20 = arith.maximumf %18, %19 : vector<20x128xf32>
    %c0_16 = arith.constant 0 : index
    %c0_17 = arith.constant 0 : index
    %21 = vector.load %arg4[%c0_16, %c0_17] : memref<20x128xf32, #tpu.memory_space<vmem>>, vector<20x128xf32>
    tpu.vector_store %arg4[%c0_16, %c0_17], %20 {strides = array<i32>} : memref<20x128xf32, #tpu.memory_space<vmem>>, vector<20x128xf32>,
    return
  }
  func.func @transform_0(%arg0: i32) -> (i32, i32) {
    %c0_i32 = arith.constant 0 : i32
    %c0_i32_0 = arith.constant 0 : i32
    %c0_i32_1 = arith.constant 0 : i32
    return %c0_i32, %c0_i32_0 : i32, i32
  }
  func.func @transform_1(%arg0: i32) -> (i32, i32) {
    %c0_i32 = arith.constant 0 : i32
    %c0_i32_0 = arith.constant 0 : i32
    %c0_i32_1 = arith.constant 0 : i32
    return %c0_i32, %c0_i32_0 : i32, i32
  }
  func.func @transform_2(%arg0: i32) -> (i32, i32, i32) {
    %c0_i32 = arith.constant 0 : i32
    %c0_i32_0 = arith.constant 0 : i32
    %c0_i32_1 = arith.constant 0 : i32
    return %c0_i32, %c0_i32_0, %arg0 : i32, i32, i32
  }
  func.func @transform_3(%arg0: i32) -> (i32, i32) {
    %c0_i32 = arith.constant 0 : i32
    %c0_i32_0 = arith.constant 0 : i32
    return %c0_i32, %arg0 : i32, i32
  }
}

module attributes {stable_mosaic.version = 11 : i64} {
  func.func @_head_kernel(%arg0: i32, %arg1: memref<320x128xbf16, #tpu.memory_space<vmem>>, %arg2: memref<50x320xbf16, #tpu.memory_space<vmem>>, %arg3: memref<50x1xf32, #tpu.memory_space<vmem>>, %arg4: memref<10x50xbf16, #tpu.memory_space<vmem>>, %arg5: memref<10x1xf32, #tpu.memory_space<vmem>>, %arg6: memref<10x128xf32, #tpu.memory_space<vmem>>) attributes {dimension_semantics = [#tpu.dimension_semantics<parallel>], iteration_bounds = array<i64: 1>, scalar_prefetch = 0 : i64, scratch_operands = 0 : i64, tpu.core_type = #tpu.core_type<tc>, window_params = [{transform_indices = @transform_0, window_bounds = array<i64: 320, 128>}, {pipeline_mode = #tpu.pipeline_mode<synchronous>, transform_indices = @transform_1, window_bounds = array<i64: 50, 320>}, {pipeline_mode = #tpu.pipeline_mode<synchronous>, transform_indices = @transform_2, window_bounds = array<i64: 50, 1>}, {pipeline_mode = #tpu.pipeline_mode<synchronous>, transform_indices = @transform_3, window_bounds = array<i64: 10, 50>}, {pipeline_mode = #tpu.pipeline_mode<synchronous>, transform_indices = @transform_4, window_bounds = array<i64: 10, 1>}, {transform_indices = @transform_5, window_bounds = array<i64: 10, 128>}]} {
    %c0 = arith.constant 0 : index
    %c0_0 = arith.constant 0 : index
    %0 = vector.load %arg2[%c0, %c0_0] : memref<50x320xbf16, #tpu.memory_space<vmem>>, vector<50x320xbf16>
    %c0_1 = arith.constant 0 : index
    %c0_2 = arith.constant 0 : index
    %1 = vector.load %arg1[%c0_1, %c0_2] : memref<320x128xbf16, #tpu.memory_space<vmem>>, vector<320x128xbf16>
    %cst = arith.constant dense<0.000000e+00> : vector<50x128xf32>
    %2 = tpu.matmul %0, %1, %cst {dimension_numbers = #tpu.dot_dimension_numbers<[1], [0], [0], [1], [0, 0, 1, 1], [], []>} : vector<50x320xbf16>, vector<320x128xbf16>, vector<50x128xf32> -> vector<50x128xf32>
    %c0_3 = arith.constant 0 : index
    %c0_4 = arith.constant 0 : index
    %3 = vector.load %arg3[%c0_3, %c0_4] : memref<50x1xf32, #tpu.memory_space<vmem>>, vector<50x1xf32>
    %4 = vector.broadcast %3 : vector<50x1xf32> to vector<50x128xf32>
    %5 = arith.addf %2, %4 : vector<50x128xf32>
    %cst_5 = arith.constant 0.000000e+00 : f32
    %6 = vector.broadcast %cst_5 : f32 to vector<50x128xf32>
    %7 = arith.maximumf %5, %6 : vector<50x128xf32>
    %c0_6 = arith.constant 0 : index
    %c0_7 = arith.constant 0 : index
    %8 = vector.load %arg4[%c0_6, %c0_7] : memref<10x50xbf16, #tpu.memory_space<vmem>>, vector<10x50xbf16>
    %9 = arith.truncf %7 : vector<50x128xf32> to vector<50x128xbf16>
    %cst_8 = arith.constant dense<0.000000e+00> : vector<10x128xf32>
    %10 = tpu.matmul %8, %9, %cst_8 {dimension_numbers = #tpu.dot_dimension_numbers<[1], [0], [0], [1], [0, 0, 1, 1], [], []>} : vector<10x50xbf16>, vector<50x128xbf16>, vector<10x128xf32> -> vector<10x128xf32>
    %c0_9 = arith.constant 0 : index
    %c0_10 = arith.constant 0 : index
    %11 = vector.load %arg5[%c0_9, %c0_10] : memref<10x1xf32, #tpu.memory_space<vmem>>, vector<10x1xf32>
    %12 = vector.broadcast %11 : vector<10x1xf32> to vector<10x128xf32>
    %13 = arith.addf %10, %12 : vector<10x128xf32>
    %cst_11 = arith.constant dense<0xFF800000> : vector<128xf32>
    %14 = vector.multi_reduction <maximumf>, %13, %cst_11 [0] : vector<10x128xf32> to vector<128xf32>
    %15 = vector.shape_cast %14 : vector<128xf32> to vector<1x128xf32>
    %16 = vector.broadcast %15 : vector<1x128xf32> to vector<10x128xf32>
    %17 = arith.subf %13, %16 : vector<10x128xf32>
    %18 = math.exp %17 : vector<10x128xf32>
    %cst_12 = arith.constant dense<0.000000e+00> : vector<128xf32>
    %19 = vector.multi_reduction <add>, %18, %cst_12 [0] : vector<10x128xf32> to vector<128xf32>
    %20 = vector.shape_cast %19 : vector<128xf32> to vector<1x128xf32>
    %21 = math.log %20 : vector<1x128xf32>
    %22 = vector.broadcast %21 : vector<1x128xf32> to vector<10x128xf32>
    %23 = arith.subf %17, %22 : vector<10x128xf32>
    %c0_13 = arith.constant 0 : index
    %c0_14 = arith.constant 0 : index
    %24 = vector.load %arg6[%c0_13, %c0_14] : memref<10x128xf32, #tpu.memory_space<vmem>>, vector<10x128xf32>
    tpu.vector_store %arg6[%c0_13, %c0_14], %23 {strides = array<i32>} : memref<10x128xf32, #tpu.memory_space<vmem>>, vector<10x128xf32>,
    return
  }
  func.func @transform_0(%arg0: i32) -> (i32, i32) {
    %c0_i32 = arith.constant 0 : i32
    %c0_i32_0 = arith.constant 0 : i32
    return %c0_i32, %arg0 : i32, i32
  }
  func.func @transform_1(%arg0: i32) -> (i32, i32) {
    %c0_i32 = arith.constant 0 : i32
    %c0_i32_0 = arith.constant 0 : i32
    %c0_i32_1 = arith.constant 0 : i32
    return %c0_i32, %c0_i32_0 : i32, i32
  }
  func.func @transform_2(%arg0: i32) -> (i32, i32) {
    %c0_i32 = arith.constant 0 : i32
    %c0_i32_0 = arith.constant 0 : i32
    %c0_i32_1 = arith.constant 0 : i32
    return %c0_i32, %c0_i32_0 : i32, i32
  }
  func.func @transform_3(%arg0: i32) -> (i32, i32) {
    %c0_i32 = arith.constant 0 : i32
    %c0_i32_0 = arith.constant 0 : i32
    %c0_i32_1 = arith.constant 0 : i32
    return %c0_i32, %c0_i32_0 : i32, i32
  }
  func.func @transform_4(%arg0: i32) -> (i32, i32) {
    %c0_i32 = arith.constant 0 : i32
    %c0_i32_0 = arith.constant 0 : i32
    %c0_i32_1 = arith.constant 0 : i32
    return %c0_i32, %c0_i32_0 : i32, i32
  }
  func.func @transform_5(%arg0: i32) -> (i32, i32) {
    %c0_i32 = arith.constant 0 : i32
    %c0_i32_0 = arith.constant 0 : i32
    return %c0_i32, %arg0 : i32, i32
  }
}

</mosaic_0001>

<bundles_post_ra>
// kernel: cnn_mnist_forward.3
= control target key start
LH: loop header
LB: loop body
LE: loop exit
PB: predicated region body
PF: predicated region fallthrough
CT: control target
= control target key end

     0   :  { %vm63_vm0 = vcmask 1043456   ;;  %vm64_vm1 = vcmask 1044480   ;;  %v744_v0 = vmov 0.0   ;;  %v745_v2 = vmov 65535   ;;  %s920_s2 = inlined_call_operand.vmem [shape: bf16[4,25,384], index: 2, kind: input, shape index: {}]   ;;  %s921_s0 = inlined_call_operand.vmem [shape: bf16[10,25], index: 0, kind: input, shape index: {}]   ;;  %s922_s1 = inlined_call_operand.vmem [shape: f32[10,1], index: 1, kind: input, shape index: {}]   ;;  %s923_s3 = inlined_call_operand.vmem [shape: f32[10,384], index: 3, kind: output, shape index: {}]  }
   0x1   :  { %674 = vmatprep.subr.bf16.mxu1 %v744_v0  ;;  %v711_v1 = vld [vmem:[%s920_s2 + $0x1c] ss:$12 sps:$4 sm:$0x1f]   ;;  %v65_v3 = vsel %vm63_vm0, 4294967295, %v745_v2  ;;  %vm746_vm2 = vmmov 0   ;;  %v747_v10 = vmov 0  }
   0x2   :  { %v772_v4 = vsel %vm64_vm1, %v65_v3, 0  ;;  %v713_v5 = vld [vmem:[%s920_s2 + $0x20] ss:$12 sps:$4 sm:$0x1f]   ;;  %678 = vmatprep.mubr.msk.bf16.mxu1 %vm746_vm2, %v744_v0  ;;  %v715_v9 = vld [vmem:[%s920_s2 + $0x4] ss:$12 sps:$4 sm:$0xff]   ;;  %108 = vmatprep.mubr.bf16.mxu0 %v747_v10 }
   0x3   :  { %v71_v6 = vand.u32 %v711_v1, %v772_v4  ;;  %v714_v7 = vld [vmem:[%s920_s2 + $0x18] ss:$12 sps:$4 sm:$0x1f]   ;;  %v74_v8 = vand.u32 %v713_v5, %v772_v4  ;;  %710 = vset.pattern.permute.xlu0 %v747_v10  ;;  %v717_v12 = vld [vmem:[%s920_s2 + $0x8] ss:$12 sps:$4 sm:$0xff]   ;;  %vm59_vm3 = vcmask 203776  }
   0x4   :  { %v68_v11 = vand.u32 %v714_v7, %v772_v4  ;;  %v718_v13 = vld [vmem:[%s920_s2] ss:$12 sps:$4 sm:$0xff]   ;;  %v720_v14 = vld [vmem:[%s920_s2 + $0x48] ss:$12 sps:$4 sm:$0x1f]  }
   0x5   :  { %88 = vmatprep.subr.bf16.mxu0 %v71_v6  ;;  %675 = vmatpush3.bf16.msra.mxu1 %v74_v8  ;;  %v722_v15 = vld [vmem:[%s920_s2 + $0x4c] ss:$12 sps:$4 sm:$0x1f]   ;;  %v806_v16 = vld [vmem:[%s921_s0] sm:$0x1f]   ;;  %v199_v20 = vand.u32 %v720_v14, %v772_v4 }
   0x6   :  { %89 = vmatpush1.bf16.msra.mxu0 %v68_v11  ;;  %676 = vmatprep.subr.bf16.mxu1 %v744_v0  ;;  %v202_v17 = vand.u32 %v722_v15, %v772_v4  ;;  %v723_v18 = vld [vmem:[%s920_s2 + $0x50] ss:$12 sps:$4 sm:$0x1f]   ;;  %v726_v21 = vld [vmem:[%s920_s2 + $0x34] ss:$12 sps:$4 sm:$0xff]  }
   0x7   :  { %90 = vmatprep.subr.bf16.mxu0 %v715_v9  ;;  %v205_v19 = vand.u32 %v723_v18, %v772_v4  ;;  %v730_v22 = vld [vmem:[%s920_s2 + $0x7c] ss:$12 sps:$4 sm:$0x1f]   ;;  %v728_v23 = vld [vmem:[%s920_s2 + $0x78] ss:$12 sps:$4 sm:$0x1f]  }
   0x8   :  { %v727_v24 = vld [vmem:[%s920_s2 + $0x38] ss:$12 sps:$4 sm:$0xff]   ;;  %v731_v25 = vld [vmem:[%s920_s2 + $0x80] ss:$12 sps:$4 sm:$0x1f]   ;;  %v339_v27 = vand.u32 %v730_v22, %v772_v4  ;;  %v336_v29 = vand.u32 %v728_v23, %v772_v4 }
   0x9   :  { %677 = vmatpush3.bf16.msra.mxu1 %v717_v12  ;;  %v724_v26 = vld [vmem:[%s920_s2 + $0x30] ss:$12 sps:$4 sm:$0xff]   ;;  %v342_v28 = vand.u32 %v731_v25, %v772_v4  ;;  %v738_v30 = vld [vmem:[%s920_s2 + $0xac] ss:$12 sps:$4 sm:$0x1f]   ;;  %v571_v34 = vld [vmem:[%s922_s1] sm:$0xff] }
   0xa   :  { %91 = vmatpush1.bf16.msra.mxu0 %v718_v13  ;;  %682 = vmatprep.subr.bf16.mxu1 %v744_v0  ;;  %v734_v31 = vld [vmem:[%s920_s2 + $0x64] ss:$12 sps:$4 sm:$0xff]   ;;  %v735_v32 = vld [vmem:[%s920_s2 + $0x68] ss:$12 sps:$4 sm:$0xff]   ;;  %v732_v35 = vld [vmem:[%s920_s2 + $0x60] ss:$12 sps:$4 sm:$0xff]   ;;  %v476_v37 = vand.u32 %v738_v30, %v772_v4 }
   0xb   :  { %219 = vmatprep.subr.bf16.mxu0 %v202_v17  ;;  %v739_v33 = vld [vmem:[%s920_s2 + $0xb0] ss:$12 sps:$4 sm:$0x1f]   ;;  %v736_v36 = vld [vmem:[%s920_s2 + $0xa8] ss:$12 sps:$4 sm:$0x1f]   ;;  %575 = vperm.xlu0 %710, %v571_v34  }
   0xc   :  { %679 = vmatmul.mubr.msk.bf16.vlgmr.msra.gmra.mxu1 %vm59_vm3, %v806_v16  ;;  %v479_v38 = vand.u32 %v739_v33, %v772_v4  ;;  %v572_v39 = vld [vmem:[%s922_s1 + $0x8] sm:$0x3]  ;;  %v473_v40 = vand.u32 %v736_v36, %v772_v4  ;;  %v742_v41 = vld [vmem:[%s920_s2 + $0x94] ss:$12 sps:$4 sm:$0xff]   ;;  %v743_v42 = vld [vmem:[%s920_s2 + $0x98] ss:$12 sps:$4 sm:$0xff]  }
   0xd   :  { %612 = vmatmul.mubr.msk.bf16.vlgmr.msra.gmra.mxu0 %vm59_vm3, %v806_v16  ;;  %683 = vmatpush3.bf16.msra.mxu1 %v205_v19  ;;  %v740_v43 = vld [vmem:[%s920_s2 + $0x90] ss:$12 sps:$4 sm:$0xff]  }
   0xe   :  { %220 = vmatpush1.bf16.msra.mxu0 %v199_v20  ;;  %684 = vmatprep.subr.bf16.mxu1 %v744_v0 }
   0xf   :  { %221 = vmatprep.subr.bf16.mxu0 %v726_v21  ;;  %686 = vmatprep.mubr.msk.bf16.mxu1 %vm746_vm2, %v744_v0 }
  0x10   :  { %239 = vmatprep.mubr.bf16.mxu0 %v747_v10  ;;  %580 = vperm.xlu0 %710, %v572_v39  }
  0x11   :  { %685 = vmatpush3.bf16.msra.mxu1 %v727_v24 }
  0x12   :  { %222 = vmatpush1.bf16.msra.mxu0 %v724_v26  ;;  %690 = vmatprep.subr.bf16.mxu1 %v744_v0 }
  0x13   :  { %356 = vmatprep.subr.bf16.mxu0 %v339_v27 }
  0x14   :  { %687 = vmatmul.mubr.msk.bf16.vlgmr.msra.gmra.mxu1 %vm59_vm3, %v806_v16 }
  0x15   :  { %628 = vmatmul.mubr.msk.bf16.vlgmr.msra.gmra.mxu0 %vm59_vm3, %v806_v16  ;;  %691 = vmatpush3.bf16.msra.mxu1 %v342_v28 }
  0x16   :  { %357 = vmatpush1.bf16.msra.mxu0 %v336_v29  ;;  %692 = vmatprep.subr.bf16.mxu1 %v744_v0 }
  0x17   :  { %358 = vmatprep.subr.bf16.mxu0 %v734_v31  ;;  %694 = vmatprep.mubr.msk.bf16.mxu1 %vm746_vm2, %v744_v0 }
  0x18   :  { %376 = vmatprep.mubr.bf16.mxu0 %v747_v10 }
  0x19   :  { %693 = vmatpush3.bf16.msra.mxu1 %v735_v32 }
  0x1a   :  { %359 = vmatpush1.bf16.msra.mxu0 %v732_v35  ;;  %698 = vmatprep.subr.bf16.mxu1 %v744_v0 }
  0x1b   :  { %493 = vmatprep.subr.bf16.mxu0 %v476_v37 }
  0x1c   :  { %695 = vmatmul.mubr.msk.bf16.vlgmr.msra.gmra.mxu1 %vm59_vm3, %v806_v16 }
  0x1d   :  { %644 = vmatmul.mubr.msk.bf16.vlgmr.msra.gmra.mxu0 %vm59_vm3, %v806_v16  ;;  %699 = vmatpush3.bf16.msra.mxu1 %v479_v38 }
  0x1e   :  { %494 = vmatpush1.bf16.msra.mxu0 %v473_v40  ;;  %700 = vmatprep.subr.bf16.mxu1 %v744_v0 }
  0x1f   :  { %495 = vmatprep.subr.bf16.mxu0 %v742_v41  ;;  %702 = vmatprep.mubr.msk.bf16.mxu1 %vm746_vm2, %v744_v0 }
  0x20   :  { %513 = vmatprep.mubr.bf16.mxu0 %v747_v10 }
  0x21   :  { %701 = vmatpush3.bf16.msra.mxu1 %v743_v42 }
  0x22   :  { %496 = vmatpush1.bf16.msra.mxu0 %v740_v43 }
  0x24   :  { %703 = vmatmul.mubr.msk.bf16.vlgmr.msra.gmra.mxu1 %vm59_vm3, %v806_v16 }
  0x25   :  { %660 = vmatmul.mubr.msk.bf16.vlgmr.msra.gmra.mxu0 %vm59_vm3, %v806_v16 }
  0x86   :  { %v576_v5 = vpop.permute.xlu0 %575 }
  0x8b   :  { %v581_v26 = vpop.permute.xlu0 %580 }
  0xcc   :  { %v153_v44 = vpop.f32.mrf.mxu1 }
  0xcd   :  { %v110_v45 = vpop.f32.mrf.mxu0 }
  0xce   :  { %v680_v46 = vpop.f32.mrf.mxu1 }
  0xcf   :  { %v112_v47 = vpop.f32.mrf.mxu0 }
  0xd0   :  { %v156_v48 = vpop.f32.mrf.mxu1 }
  0xd1   :  { %v114_v49 = vpop.f32.mrf.mxu0 }
  0xd2   :  { %v681_v50 = vpop.f32.mrf.mxu1 }
  0xd3   :  { %v116_v51 = vpop.f32.mrf.mxu0 }
  0xd4   :  { %v284_v52 = vpop.f32.mrf.mxu1 }
  0xd5   :  { %v241_v53 = vpop.f32.mrf.mxu0  ;;  %v293_v1 = vmax.f32 %v153_v44, %v284_v52 }
  0xd6   :  { %v688_v54 = vpop.f32.mrf.mxu1  ;;  %v291_v3 = vmax.f32 %v110_v45, %v241_v53 }
  0xd7   :  { %v243_v55 = vpop.f32.mrf.mxu0 }
  0xd8   :  { %v287_v56 = vpop.f32.mrf.mxu1  ;;  %v292_v8 = vmax.f32 %v112_v47, %v243_v55 }
  0xd9   :  { %v245_v57 = vpop.f32.mrf.mxu0  ;;  %v296_v11 = vmax.f32 %v156_v48, %v287_v56 }
  0xda   :  { %v689_v58 = vpop.f32.mrf.mxu1  ;;  %v294_v14 = vmax.f32 %v114_v49, %v245_v57 }
  0xdb   :  { %v247_v59 = vpop.f32.mrf.mxu0 }
  0xdc   :  { %v421_v60 = vpop.f32.mrf.mxu1  ;;  %v295_v21 = vmax.f32 %v116_v51, %v247_v59 }
  0xdd   :  { %v378_v61 = vpop.f32.mrf.mxu0  ;;  %v430_v6 = vmax.f32 %v293_v1, %v421_v60 }
  0xde   :  { %v696_v62 = vpop.f32.mrf.mxu1  ;;  %v428_v9 = vmax.f32 %v291_v3, %v378_v61 }
  0xdf   :  { %v380_v63 = vpop.f32.mrf.mxu0 }
  0xe0   :  { %v424_v0 = vpop.f32.mrf.mxu1  ;;  %v429_v15 = vmax.f32 %v292_v8, %v380_v63 }
  0xe1   :  { %v382_v2 = vpop.f32.mrf.mxu0  ;;  %v433_v18 = vmax.f32 %v296_v11, %v424_v0 }
  0xe2   :  { %v697_v4 = vpop.f32.mrf.mxu1  ;;  %v431_v22 = vmax.f32 %v294_v14, %v382_v2 }
  0xe3   :  { %v384_v7 = vpop.f32.mrf.mxu0 }
  0xe4   :  { %v558_v10 = vpop.f32.mrf.mxu1  ;;  %v432_v30 = vmax.f32 %v295_v21, %v384_v7 }
  0xe5   :  { %v567_v12 = vmax.f32 %v430_v6, %v558_v10  ;;  %v515_v13 = vpop.f32.mrf.mxu0 }
  0xe6   :  { %v565_v16 = vmax.f32 %v428_v9, %v515_v13  ;;  %v704_v17 = vpop.f32.mrf.mxu1 }
  0xe7   :  { %v585_v19 = vadd.f32 %v576_v5, %v567_v12  ;;  %v517_v20 = vpop.f32.mrf.mxu0 }
  0xe8   :  { %v583_v23 = vadd.f32 %v576_v5, %v565_v16  ;;  %v566_v24 = vmax.f32 %v429_v15, %v517_v20  ;;  %v561_v25 = vpop.f32.mrf.mxu1 }
  0xe9   :  { %v591_v27 = vmax.f32 %v585_v19, 0.0  ;;  %v570_v28 = vmax.f32 %v433_v18, %v561_v25  ;;  %v519_v29 = vpop.f32.mrf.mxu0 }
  0xea   :  { %v589_v31 = vmax.f32 %v583_v23, 0.0  ;;  %v584_v32 = vadd.f32 %v576_v5, %v566_v24  ;;  %v568_v33 = vmax.f32 %v431_v22, %v519_v29  ;;  %v705_v34 = vpop.f32.mrf.mxu1 }
  0xeb   :  { %597 = vst [vmem:[%s923_s3 + $0x10] sm:$0xff] %v591_v27  ;;  %v588_v35 = vadd.f32 %v581_v26, %v570_v28  ;;  %v521_v36 = vpop.f32.mrf.mxu0 }
  0xec   :  { %595 = vst [vmem:[%s923_s3] sm:$0xff] %v589_v31  ;;  %v590_v37 = vmax.f32 %v584_v32, 0.0  ;;  %v586_v38 = vadd.f32 %v581_v26, %v568_v33  ;;  %v569_v39 = vmax.f32 %v432_v30, %v521_v36 }
  0xed   :  { %v594_v40 = vmax.f32 %v588_v35, 0.0 }
  0xee   :  { %596 = vst [vmem:[%s923_s3 + $0x8] sm:$0xff] %v590_v37  ;;  %v592_v41 = vmax.f32 %v586_v38, 0.0  ;;  %v587_v42 = vadd.f32 %v581_v26, %v569_v39 }
  0xef   :  { %600 = vst [vmem:[%s923_s3 + $0x28] sm:$0x3] %v594_v40 }
  0xf0   :  { %598 = vst [vmem:[%s923_s3 + $0x18] sm:$0x3] %v592_v41  ;;  %v593_v43 = vmax.f32 %v587_v42, 0.0 }
  0xf2   :  { %599 = vst [vmem:[%s923_s3 + $0x20] sm:$0x3] %v593_v43 }

// kernel: cnn_mnist_forward.4
= control target key start
LH: loop header
LB: loop body
LE: loop exit
PB: predicated region body
PF: predicated region fallthrough
CT: control target
= control target key end

     0   :  { %vm167_vm0 = vcmask 1044480   ;;  %v1156_v1 = vmov 0   ;;  %vm160_vm1 = vcmask 998400   ;;  %s1420_s2 = inlined_call_operand.vmem [shape: bf16[4,250,128], index: 2, kind: input, shape index: {}]   ;;  %s1421_s0 = inlined_call_operand.vmem [shape: bf16[20,250], index: 0, kind: input, shape index: {}]   ;;  %s1422_s1 = inlined_call_operand.vmem [shape: f32[20,1], index: 1, kind: input, shape index: {}]   ;;  %s1423_s3 = inlined_call_operand.vmem [shape: f32[20,128], index: 3, kind: output, shape index: {}]  }
   0x1   :  { %v1087_v0 = vld [vmem:[%s1420_s2 + $0x78] sm:$0x1f]   ;;  %1085 = vset.pattern.permute.xlu0 %v1156_v1  ;;  %1086 = vset.pattern.permute.xlu1 %v1156_v1  ;;  %v1091_v5 = vld [vmem:[%s1420_s2 + $0x70] sm:$0xff]   ;;  %v1095_v9 = vld [vmem:[%s1420_s2 + $0x68] sm:$0xff]  }
   0x2   :  { %v1088_v2 = vld [vmem:[%s1420_s2 + $0xf8] sm:$0x1f]   ;;  %1080 = vmatprep.subr.msk.bf16.mxu0 %vm167_vm0, %v1087_v0  ;;  %v1092_v6 = vld [vmem:[%s1420_s2 + $0xf0] sm:$0xff]   ;;  %v1096_v10 = vld [vmem:[%s1420_s2 + $0xe8] sm:$0xff]  }
   0x3   :  { %v1089_v3 = vld [vmem:[%s1420_s2 + $0x38] sm:$0xff]   ;;  %1081 = vmatprep.subr.msk.bf16.mxu1 %vm167_vm0, %v1088_v2  ;;  %v1093_v7 = vld [vmem:[%s1420_s2 + $0x30] sm:$0xff]   ;;  %v1097_v11 = vld [vmem:[%s1420_s2 + $0x28] sm:$0xff]  }
   0x4   :  { %v1090_v4 = vld [vmem:[%s1420_s2 + $0xb8] sm:$0xff]   ;;  %969 = vmatpush3.bf16.msra.mxu0 %v1089_v3  ;;  %v1094_v8 = vld [vmem:[%s1420_s2 + $0xb0] sm:$0xff]   ;;  %v1098_v12 = vld [vmem:[%s1420_s2 + $0xa8] sm:$0xff]  }
   0x5   :  { %997 = vmatpush3.bf16.msra.mxu1 %v1090_v4  ;;  %970 = vmatprep.subr.bf16.mxu0 %v1091_v5  ;;  %v1099_v13 = vld [vmem:[%s1420_s2 + $0x60] sm:$0xff]   ;;  %v1103_v17 = vld [vmem:[%s1420_s2 + $0x58] sm:$0xff]   ;;  %v1107_v21 = vld [vmem:[%s1420_s2 + $0x50] sm:$0xff]  }
   0x6   :  { %998 = vmatprep.subr.bf16.mxu1 %v1092_v6  ;;  %v1100_v14 = vld [vmem:[%s1420_s2 + $0xe0] sm:$0xff]   ;;  %v1104_v18 = vld [vmem:[%s1420_s2 + $0xd8] sm:$0xff]   ;;  %v1108_v22 = vld [vmem:[%s1420_s2 + $0xd0] sm:$0xff]  }
   0x7   :  { %v1101_v15 = vld [vmem:[%s1420_s2 + $0x20] sm:$0xff]   ;;  %v1105_v19 = vld [vmem:[%s1420_s2 + $0x18] sm:$0xff]   ;;  %v1109_v23 = vld [vmem:[%s1420_s2 + $0x10] sm:$0xff]  }
   0x8   :  { %971 = vmatpush3.bf16.msra.mxu0 %v1093_v7  ;;  %v1102_v16 = vld [vmem:[%s1420_s2 + $0xa0] sm:$0xff]   ;;  %v1106_v20 = vld [vmem:[%s1420_s2 + $0x98] sm:$0xff]   ;;  %v1110_v24 = vld [vmem:[%s1420_s2 + $0x90] sm:$0xff]  }
   0x9   :  { %999 = vmatpush3.bf16.msra.mxu1 %v1094_v8  ;;  %972 = vmatprep.subr.bf16.mxu0 %v1095_v9  ;;  %v1111_v25 = vld [vmem:[%s1420_s2 + $0x48] sm:$0xff]   ;;  %v1115_v29 = vld [vmem:[%s1420_s2 + $0x40] sm:$0xff]   ;;  %v1122_v35 = vld [vmem:[%s1420_s2 + $0x178] sm:$0x1f]  }
   0xa   :  { %1000 = vmatprep.subr.bf16.mxu1 %v1096_v10  ;;  %v1112_v26 = vld [vmem:[%s1420_s2 + $0xc8] sm:$0xff]   ;;  %v1116_v30 = vld [vmem:[%s1420_s2 + $0xc0] sm:$0xff]   ;;  %v1123_v36 = vld [vmem:[%s1420_s2 + $0x1f8] sm:$0x1f]  }
   0xb   :  { %v1113_v27 = vld [vmem:[%s1420_s2 + $0x8] sm:$0xff]   ;;  %v1117_v31 = vld [vmem:[%s1420_s2] sm:$0xff]   ;;  %v1124_v37 = vld [vmem:[%s1420_s2 + $0x138] sm:$0xff]  }
   0xc   :  { %973 = vmatpush3.bf16.msra.mxu0 %v1097_v11  ;;  %v1114_v28 = vld [vmem:[%s1420_s2 + $0x88] sm:$0xff]   ;;  %v1118_v32 = vld [vmem:[%s1420_s2 + $0x80] sm:$0xff]   ;;  %v1125_v38 = vld [vmem:[%s1420_s2 + $0x1b8] sm:$0xff]  }
   0xd   :  { %1001 = vmatpush3.bf16.msra.mxu1 %v1098_v12  ;;  %974 = vmatprep.subr.bf16.mxu0 %v1099_v13  ;;  %v1278_v33 = vld [vmem:[%s1421_s0 + $0x4] ss:$8 sps:$4 sm:$0xff]   ;;  %v1283_v34 = vld [vmem:[%s1421_s0] ss:$8 sps:$4 sm:$0xff]   ;;  %v1126_v39 = vld [vmem:[%s1420_s2 + $0x170] sm:$0xff]  }
   0xe   :  { %1002 = vmatprep.subr.bf16.mxu1 %v1100_v14  ;;  %816 = vmatprep.mubr.msk.bf16.mxu0 %vm160_vm1, %v1278_v33  ;;  %v1127_v40 = vld [vmem:[%s1420_s2 + $0x1f0] sm:$0xff]   ;;  %v1130_v43 = vld [vmem:[%s1420_s2 + $0x168] sm:$0xff]   ;;  %v1134_v47 = vld [vmem:[%s1420_s2 + $0x160] sm:$0xff]  }
   0xf   :  { %866 = vmatprep.mubr.msk.bf16.mxu1 %vm160_vm1, %v1278_v33  ;;  %v1128_v41 = vld [vmem:[%s1420_s2 + $0x130] sm:$0xff]   ;;  %v1131_v44 = vld [vmem:[%s1420_s2 + $0x1e8] sm:$0xff]   ;;  %v1135_v48 = vld [vmem:[%s1420_s2 + $0x1e0] sm:$0xff]  }
  0x10   :  { %975 = vmatpush3.bf16.msra.mxu0 %v1101_v15  ;;  %v1129_v42 = vld [vmem:[%s1420_s2 + $0x1b0] sm:$0xff]   ;;  %v1132_v45 = vld [vmem:[%s1420_s2 + $0x128] sm:$0xff]   ;;  %v1136_v49 = vld [vmem:[%s1420_s2 + $0x120] sm:$0xff]  }
  0x11   :  { %1003 = vmatpush3.bf16.msra.mxu1 %v1102_v16  ;;  %976 = vmatprep.subr.bf16.mxu0 %v1103_v17  ;;  %v1133_v46 = vld [vmem:[%s1420_s2 + $0x1a8] sm:$0xff]   ;;  %v1137_v50 = vld [vmem:[%s1420_s2 + $0x1a0] sm:$0xff]   ;;  %v1138_v51 = vld [vmem:[%s1420_s2 + $0x158] sm:$0xff]  }
  0x12   :  { %1004 = vmatprep.subr.bf16.mxu1 %v1104_v18  ;;  %v1139_v52 = vld [vmem:[%s1420_s2 + $0x1d8] sm:$0xff]   ;;  %v17_v53 = vld [vmem:[%s1421_s0 + $0x10] sm:$0x33]  ;;  %v1148_v62 = vld [vmem:[%s1420_s2 + $0x148] sm:$0xff]  }
  0x13   :  { %v799_v54 = vcombine.high %v17_v53, %v17_v53  ;;  %v1141_v55 = vld [vmem:[%s1420_s2 + $0x118] sm:$0xff]   ;;  %v798_v56 = vcombine.low %v17_v53, %v17_v53  ;;  %v1144_v58 = vld [vmem:[%s1420_s2 + $0x150] sm:$0xff]   ;;  %v1149_v63 = vld [vmem:[%s1420_s2 + $0x1c8] sm:$0xff]  }
  0x14   :  { %977 = vmatpush3.bf16.msra.mxu0 %v1105_v19  ;;  %v1142_v57 = vld [vmem:[%s1420_s2 + $0x198] sm:$0xff]   ;;  %v1145_v59 = vld [vmem:[%s1420_s2 + $0x1d0] sm:$0xff]   ;;  %v1150_v0 = vld [vmem:[%s1420_s2 + $0x108] sm:$0xff]  }
  0x15   :  { %1005 = vmatpush3.bf16.msra.mxu1 %v1106_v20  ;;  %978 = vmatprep.subr.bf16.mxu0 %v1107_v21  ;;  %v1146_v60 = vld [vmem:[%s1420_s2 + $0x110] sm:$0xff]   ;;  %v1151_v1 = vld [vmem:[%s1420_s2 + $0x188] sm:$0xff]   ;;  %v1152_v2 = vld [vmem:[%s1420_s2 + $0x140] sm:$0xff]  }
  0x16   :  { %1006 = vmatprep.subr.bf16.mxu1 %v1108_v22  ;;  %v1147_v61 = vld [vmem:[%s1420_s2 + $0x190] sm:$0xff]   ;;  %v1153_v3 = vld [vmem:[%s1420_s2 + $0x1c0] sm:$0xff]   ;;  %v766_v8 = vld [vmem:[%s1422_s1 + $0x8] sm:$0xff] }
  0x17   :  { %v1154_v4 = vld [vmem:[%s1420_s2 + $0x100] sm:$0xff]   ;;  %v767_v7 = vld [vmem:[%s1422_s1 + $0x10] sm:$0xf] }
  0x18   :  { %979 = vmatpush3.bf16.msra.mxu0 %v1109_v23  ;;  %v1155_v5 = vld [vmem:[%s1420_s2 + $0x180] sm:$0xff]   ;;  %780 = vperm.xlu1 %1086, %v767_v7  }
  0x19   :  { %1007 = vmatpush3.bf16.msra.mxu1 %v1110_v24  ;;  %980 = vmatprep.subr.bf16.mxu0 %v1111_v25  ;;  %v765_v6 = vld [vmem:[%s1422_s1] sm:$0xff] }
  0x1a   :  { %1008 = vmatprep.subr.bf16.mxu1 %v1112_v26  ;;  %770 = vperm.xlu0 %1085, %v765_v6  }
  0x1c   :  { %981 = vmatpush3.bf16.msra.mxu0 %v1113_v27 }
  0x1d   :  { %1009 = vmatpush3.bf16.msra.mxu1 %v1114_v28  ;;  %982 = vmatprep.subr.bf16.mxu0 %v1115_v29 }
  0x1e   :  { %1010 = vmatprep.subr.bf16.mxu1 %v1116_v30  ;;  %775 = vperm.xlu0 %1085, %v766_v8  }
  0x20   :  { %983 = vmatpush3.bf16.msra.mxu0 %v1117_v31 }
  0x21   :  { %1011 = vmatpush3.bf16.msra.mxu1 %v1118_v32  ;;  %1082 = vmatprep.subr.msk.bf16.mxu0 %vm167_vm0, %v1122_v35 }
  0x22   :  { %1083 = vmatprep.subr.msk.bf16.mxu1 %vm167_vm0, %v1123_v36 }
  0x23   :  { %204 = vmatmul.mubr.bf16.vlgmr.msra.gmra.mxu0 %v1283_v34 }
  0x24   :  { %383 = vmatmul.mubr.bf16.vlgmr.msra.gmra.mxu1 %v1283_v34  ;;  %1025 = vmatpush3.bf16.msra.mxu0 %v1124_v37 }
  0x25   :  { %1053 = vmatpush3.bf16.msra.mxu1 %v1125_v38  ;;  %1026 = vmatprep.subr.bf16.mxu0 %v1126_v39 }
  0x26   :  { %1054 = vmatprep.subr.bf16.mxu1 %v1127_v40  ;;  %817 = vmatprep.mubr.msk.bf16.mxu0 %vm160_vm1, %v799_v54 }
  0x27   :  { %867 = vmatprep.mubr.msk.bf16.mxu1 %vm160_vm1, %v799_v54 }
  0x28   :  { %1027 = vmatpush3.bf16.msra.mxu0 %v1128_v41 }
  0x29   :  { %1055 = vmatpush3.bf16.msra.mxu1 %v1129_v42  ;;  %1028 = vmatprep.subr.bf16.mxu0 %v1130_v43 }
  0x2a   :  { %1056 = vmatprep.subr.bf16.mxu1 %v1131_v44 }
  0x2b   :  { %212 = vmatmul.mubr.bf16.gmra.mxu0 %v798_v56 }
  0x2c   :  { %1029 = vmatpush3.bf16.msra.mxu0 %v1132_v45  ;;  %391 = vmatmul.mubr.bf16.gmra.mxu1 %v798_v56 }
  0x2d   :  { %1057 = vmatpush3.bf16.msra.mxu1 %v1133_v46  ;;  %1030 = vmatprep.subr.bf16.mxu0 %v1134_v47 }
  0x2e   :  { %1058 = vmatprep.subr.bf16.mxu1 %v1135_v48  ;;  %916 = vmatprep.mubr.msk.bf16.mxu0 %vm160_vm1, %v1278_v33 }
  0x2f   :  { %966 = vmatprep.mubr.msk.bf16.mxu1 %vm160_vm1, %v1278_v33 }
  0x30   :  { %1031 = vmatpush3.bf16.msra.mxu0 %v1136_v49 }
  0x31   :  { %1059 = vmatpush3.bf16.msra.mxu1 %v1137_v50  ;;  %1032 = vmatprep.subr.bf16.mxu0 %v1138_v51 }
  0x32   :  { %1060 = vmatprep.subr.bf16.mxu1 %v1139_v52 }
  0x34   :  { %1033 = vmatpush3.bf16.msra.mxu0 %v1141_v55 }
  0x35   :  { %1061 = vmatpush3.bf16.msra.mxu1 %v1142_v57  ;;  %1034 = vmatprep.subr.bf16.mxu0 %v1144_v58 }
  0x36   :  { %1062 = vmatprep.subr.bf16.mxu1 %v1145_v59 }
  0x38   :  { %1035 = vmatpush3.bf16.msra.mxu0 %v1146_v60 }
  0x39   :  { %1063 = vmatpush3.bf16.msra.mxu1 %v1147_v61  ;;  %1036 = vmatprep.subr.bf16.mxu0 %v1148_v62 }
  0x3a   :  { %1064 = vmatprep.subr.bf16.mxu1 %v1149_v63 }
  0x3c   :  { %1037 = vmatpush3.bf16.msra.mxu0 %v1150_v0 }
  0x3d   :  { %1065 = vmatpush3.bf16.msra.mxu1 %v1151_v1  ;;  %1038 = vmatprep.subr.bf16.mxu0 %v1152_v2 }
  0x3e   :  { %1066 = vmatprep.subr.bf16.mxu1 %v1153_v3 }
  0x40   :  { %1039 = vmatpush3.bf16.msra.mxu0 %v1154_v4 }
  0x41   :  { %1067 = vmatpush3.bf16.msra.mxu1 %v1155_v5 }
  0x43   :  { %565 = vmatmul.mubr.bf16.vlgmr.msra.gmra.mxu0 %v1283_v34 }
  0x44   :  { %747 = vmatmul.mubr.bf16.vlgmr.msra.gmra.mxu1 %v1283_v34  ;;  %917 = vmatprep.mubr.msk.bf16.mxu0 %vm160_vm1, %v799_v54 }
  0x45   :  { %967 = vmatprep.mubr.msk.bf16.mxu1 %vm160_vm1, %v799_v54 }
  0x4b   :  { %573 = vmatmul.mubr.bf16.gmra.mxu0 %v798_v56 }
  0x4c   :  { %755 = vmatmul.mubr.bf16.gmra.mxu1 %v798_v56 }
  0x93   :  { %v781_v1 = vpop.permute.xlu1 %780 }
  0x95   :  { %v771_v36 = vpop.permute.xlu0 %770 }
  0x99   :  { %v776_v53 = vpop.permute.xlu0 %775 }
  0xe3   :  { %v984_v9 = vpop.f32.mrf.mxu0 }
  0xe4   :  { %v1012_v10 = vpop.f32.mrf.mxu1 }
  0xe5   :  { %v985_v11 = vpop.f32.mrf.mxu0 }
  0xe6   :  { %v1013_v12 = vpop.f32.mrf.mxu1  ;;  %v986_v25 = vadd.f32 %v985_v11, %v984_v9 }
  0xe7   :  { %v987_v13 = vpop.f32.mrf.mxu0  ;;  %v1014_v26 = vadd.f32 %v1013_v12, %v1012_v10 }
  0xe8   :  { %v1015_v14 = vpop.f32.mrf.mxu1 }
  0xe9   :  { %v988_v15 = vpop.f32.mrf.mxu0  ;;  %v398_v32 = vmax.f32 %v986_v25, %v1014_v26 }
  0xea   :  { %v1016_v16 = vpop.f32.mrf.mxu1  ;;  %v989_v29 = vadd.f32 %v988_v15, %v987_v13 }
  0xeb   :  { %v990_v17 = vpop.f32.mrf.mxu0  ;;  %v1017_v30 = vadd.f32 %v1016_v16, %v1015_v14 }
  0xec   :  { %v1018_v19 = vpop.f32.mrf.mxu1 }
  0xed   :  { %v991_v18 = vpop.f32.mrf.mxu0  ;;  %v399_v40 = vmax.f32 %v989_v29, %v1017_v30 }
  0xee   :  { %v1019_v21 = vpop.f32.mrf.mxu1  ;;  %v992_v42 = vadd.f32 %v991_v18, %v990_v17 }
  0xef   :  { %v993_v20 = vpop.f32.mrf.mxu0  ;;  %v1020_v43 = vadd.f32 %v1019_v21, %v1018_v19 }
  0xf0   :  { %v1021_v23 = vpop.f32.mrf.mxu1 }
  0xf1   :  { %v994_v22 = vpop.f32.mrf.mxu0  ;;  %v400_v54 = vmax.f32 %v992_v42, %v1020_v43 }
  0xf2   :  { %v1022_v24 = vpop.f32.mrf.mxu1 }
 0x103   :  { %v1040_v27 = vpop.f32.mrf.mxu0 }
 0x104   :  { %v1068_v28 = vpop.f32.mrf.mxu1 }
 0x105   :  { %v1041_v31 = vpop.f32.mrf.mxu0 }
 0x106   :  { %v1042_v33 = vadd.f32 %v1041_v31, %v1040_v27  ;;  %v1069_v34 = vpop.f32.mrf.mxu1 }
 0x107   :  { %v1043_v35 = vpop.f32.mrf.mxu0  ;;  %v1070_v38 = vadd.f32 %v1069_v34, %v1068_v28 }
 0x108   :  { %v580_v37 = vmax.f32 %v398_v32, %v1042_v33  ;;  %v1071_v39 = vpop.f32.mrf.mxu1 }
 0x109   :  { %v1044_v41 = vpop.f32.mrf.mxu0 }
 0x10a   :  { %v1045_v44 = vadd.f32 %v1044_v41, %v1043_v35  ;;  %v1072_v45 = vpop.f32.mrf.mxu1  ;;  %v762_v46 = vmax.f32 %v580_v37, %v1070_v38 }
 0x10b   :  { %v1046_v47 = vpop.f32.mrf.mxu0  ;;  %v1073_v49 = vadd.f32 %v1072_v45, %v1071_v39 }
 0x10c   :  { %v581_v48 = vmax.f32 %v399_v40, %v1045_v44  ;;  %v783_v50 = vadd.f32 %v771_v36, %v762_v46  ;;  %v1074_v51 = vpop.f32.mrf.mxu1 }
 0x10d   :  { %v1047_v52 = vpop.f32.mrf.mxu0 }
 0x10e   :  { %v786_v55 = vmax.f32 %v783_v50, 0.0  ;;  %v1048_v56 = vadd.f32 %v1047_v52, %v1046_v47  ;;  %v1075_v57 = vpop.f32.mrf.mxu1  ;;  %v763_v58 = vmax.f32 %v581_v48, %v1073_v49 }
 0x10f   :  { %v1049_v59 = vpop.f32.mrf.mxu0  ;;  %v1076_v61 = vadd.f32 %v1075_v57, %v1074_v51 }
 0x110   :  { %789 = vst [vmem:[%s1423_s3] sm:$0xff] %v786_v55  ;;  %v582_v60 = vmax.f32 %v400_v54, %v1048_v56  ;;  %v784_v62 = vadd.f32 %v776_v53, %v763_v58  ;;  %v1077_v63 = vpop.f32.mrf.mxu1 }
 0x111   :  { %v1050_v0 = vpop.f32.mrf.mxu0 }
 0x112   :  { %v787_v2 = vmax.f32 %v784_v62, 0.0  ;;  %v1078_v3 = vpop.f32.mrf.mxu1  ;;  %v764_v4 = vmax.f32 %v582_v60, %v1076_v61 }
 0x114   :  { %790 = vst [vmem:[%s1423_s3 + $0x8] sm:$0xff] %v787_v2  ;;  %v785_v5 = vadd.f32 %v781_v1, %v764_v4 }
 0x116   :  { %v788_v6 = vmax.f32 %v785_v5, 0.0 }
 0x118   :  { %791 = vst [vmem:[%s1423_s3 + $0x10] sm:$0xf] %v788_v6 }

// kernel: cnn_mnist_forward.5
= control target key start
LH: loop header
LB: loop body
LE: loop exit
PB: predicated region body
PF: predicated region fallthrough
CT: control target
= control target key end

     0   :  { %v711_v1 = vmov 0   ;;  %vm292_vm0 = vcmask 523264   ;;  %v712_v43 = vmov 0.0   ;;  %vm713_vm1 = vmmov 0   ;;  %s884_s0 = inlined_call_operand.vmem [shape: bf16[320,128], index: 0, kind: input, shape index: {}]   ;;  %s885_s1 = inlined_call_operand.vmem [shape: bf16[50,320], index: 1, kind: input, shape index: {}]   ;;  %s886_s2 = inlined_call_operand.vmem [shape: f32[50,1], index: 2, kind: input, shape index: {}]   ;;  %s887_s4 = inlined_call_operand.vmem [shape: f32[10,1], index: 4, kind: input, shape index: {}]   ;;  %s888_s3 = inlined_call_operand.vmem [shape: bf16[10,50], index: 3, kind: input, shape index: {}]   ;;  %s889_s5 = inlined_call_operand.vmem [shape: f32[10,128], index: 5, kind: output, shape index: {}]  }
   0x1   :  { %v669_v0 = vld [vmem:[%s884_s0 + $0x78] sm:$0xff]   ;;  %668 = vset.pattern.permute.xlu1 %v711_v1  ;;  %667 = vset.pattern.permute.xlu0 %v711_v1  ;;  %v671_v3 = vld [vmem:[%s884_s0 + $0x70] sm:$0xff]   ;;  %v673_v5 = vld [vmem:[%s884_s0 + $0x68] sm:$0xff]   ;;  %vm467_vm2 = vcmask 1040384   ;;  %vm463_vm3 = vcmask 408576   ;;  %vm512_vm4 = vcmask 1041408  }
   0x2   :  { %v670_v2 = vld [vmem:[%s884_s0 + $0x38] sm:$0xff]   ;;  %583 = vmatprep.subr.bf16.mxu0 %v669_v0  ;;  %v672_v4 = vld [vmem:[%s884_s0 + $0x30] sm:$0xff]   ;;  %v674_v6 = vld [vmem:[%s884_s0 + $0x28] sm:$0xff]  }
   0x3   :  { %584 = vmatpush3.bf16.msra.mxu0 %v670_v2  ;;  %v675_v7 = vld [vmem:[%s884_s0 + $0x60] sm:$0xff]   ;;  %v680_v9 = vld [vmem:[%s884_s0 + $0x98] sm:$0xff]   ;;  %v683_v11 = vld [vmem:[%s884_s0 + $0x90] sm:$0xff]  }
   0x4   :  { %585 = vmatprep.subr.bf16.mxu0 %v671_v3  ;;  %v676_v8 = vld [vmem:[%s884_s0 + $0x20] sm:$0xff]   ;;  %v677_v10 = vld [vmem:[%s884_s0 + $0x58] sm:$0xff]   ;;  %636 = vmatprep.subr.bf16.mxu1 %v680_v9  ;;  %v679_v13 = vld [vmem:[%s884_s0 + $0x50] sm:$0xff]  }
   0x5   :  { %637 = vmatpush3.bf16.msra.mxu1 %v680_v9  ;;  %v678_v12 = vld [vmem:[%s884_s0 + $0x18] sm:$0xff]   ;;  %v686_v14 = vld [vmem:[%s884_s0 + $0x88] sm:$0xff]   ;;  %v681_v15 = vld [vmem:[%s884_s0 + $0x10] sm:$0xff]  }
   0x6   :  { %638 = vmatprep.subr.bf16.mxu1 %v683_v11  ;;  %v682_v16 = vld [vmem:[%s884_s0 + $0x48] sm:$0xff]   ;;  %v690_v17 = vld [vmem:[%s885_s1 + $0x4] ss:$12 sps:$4 sm:$0xff]   ;;  %v78_v33 = vld [vmem:[%s886_s2 + $0x18] sm:$0xff] }
   0x7   :  { %586 = vmatpush3.bf16.msra.mxu0 %v672_v4  ;;  %v691_v18 = vld [vmem:[%s884_s0 + $0x80] sm:$0xff]   ;;  %337 = vmatprep.mubr.bf16.mxu0 %v690_v17  ;;  %v692_v19 = vld [vmem:[%s885_s1 + $0x8] ss:$12 sps:$4 sm:$0xff]   ;;  %v81_v26 = vld [vmem:[%s886_s2 + $0x30] sm:$0x3] }
   0x8   :  { %587 = vmatprep.subr.bf16.mxu0 %v673_v5  ;;  %v684_v20 = vld [vmem:[%s884_s0 + $0x8] sm:$0xff]   ;;  %v685_v21 = vld [vmem:[%s884_s0 + $0x40] sm:$0xff]   ;;  %644 = vmatprep.mubr.msk.bf16.mxu1 %vm292_vm0, %v692_v19  ;;  %v77_v27 = vld [vmem:[%s886_s2 + $0x10] sm:$0xff] }
   0x9   :  { %639 = vmatpush3.bf16.msra.mxu1 %v683_v11  ;;  %v693_v22 = vld [vmem:[%s885_s1 + $0x20] ss:$12 sps:$4 sm:$0xff]   ;;  %v700_v23 = vld [vmem:[%s885_s1 + $0x38] ss:$12 sps:$4 sm:$0xff]   ;;  %114 = vperm.xlu0 %667, %v81_v26   ;;  %v694_v30 = vld [vmem:[%s885_s1 + $0x1c] ss:$12 sps:$4 sm:$0xff]  }
   0xa   :  { %640 = vmatprep.subr.bf16.mxu1 %v686_v14  ;;  %v687_v24 = vld [vmem:[%s884_s0] sm:$0xff]   ;;  %v80_v25 = vld [vmem:[%s886_s2 + $0x28] sm:$0xff]  ;;  %v701_v31 = vld [vmem:[%s885_s1 + $0x50] ss:$0 sps:$4 sm:$0x11]  }
   0xb   :  { %588 = vmatpush3.bf16.msra.mxu0 %v674_v6  ;;  %109 = vperm.xlu1 %668, %v80_v25   ;;  %v688_v28 = vld [vmem:[%s885_s1] ss:$12 sps:$4 sm:$0xff]   ;;  %v447_v34 = vld [vmem:[%s887_s4 + $0x8] sm:$0x3]  ;;  %v696_v35 = vld [vmem:[%s885_s1 + $0x18] ss:$12 sps:$4 sm:$0xff]  }
   0xc   :  { %589 = vmatprep.subr.bf16.mxu0 %v675_v7  ;;  %v79_v29 = vld [vmem:[%s886_s2 + $0x20] sm:$0xff]  ;;  %v76_v36 = vld [vmem:[%s886_s2 + $0x8] sm:$0xff]  ;;  %v699_v40 = vld [vmem:[%s885_s1 + $0x30] ss:$12 sps:$4 sm:$0xff]  }
   0xd   :  { %641 = vmatpush3.bf16.msra.mxu1 %v686_v14  ;;  %104 = vperm.xlu0 %667, %v79_v29   ;;  %v75_v32 = vld [vmem:[%s886_s2] sm:$0xff]  ;;  %v33_v39 = vld [vmem:[%s885_s1 + $0x48] sm:$0x11] }
   0xe   :  { %642 = vmatprep.subr.bf16.mxu1 %v691_v18  ;;  %v697_v37 = vld [vmem:[%s885_s1 + $0x34] ss:$12 sps:$4 sm:$0xff]   ;;  %v555_v41 = vcombine.high %v33_v39, %v33_v39  ;;  %v554_v42 = vcombine.low %v33_v39, %v33_v39 }
   0xf   :  { %590 = vmatpush3.bf16.msra.mxu0 %v676_v8  ;;  %94 = vperm.xlu1 %668, %v77_v27   ;;  %v446_v38 = vld [vmem:[%s887_s4] sm:$0xff] }
  0x10   :  { %591 = vmatprep.subr.bf16.mxu0 %v677_v10 }
  0x11   :  { %643 = vmatpush3.bf16.msra.mxu1 %v691_v18  ;;  %99 = vperm.xlu0 %667, %v78_v33  }
  0x12   :  { %652 = vmatprep.subr.bf16.mxu1 %v712_v43 }
  0x13   :  { %592 = vmatpush3.bf16.msra.mxu0 %v678_v12  ;;  %84 = vperm.xlu1 %668, %v75_v32  }
  0x14   :  { %593 = vmatprep.subr.bf16.mxu0 %v679_v13  ;;  %645 = vmatmul.mubr.msk.bf16.vlgmr.msra.gmra.mxu1 %vm292_vm0, %v693_v22 }
  0x15   :  { %648 = vmatprep.mubr.msk.bf16.mxu1 %vm292_vm0, %v700_v23  ;;  %89 = vperm.xlu0 %667, %v76_v36  }
  0x17   :  { %594 = vmatpush3.bf16.msra.mxu0 %v681_v15  ;;  %455 = vperm.xlu1 %668, %v447_v34  }
  0x18   :  { %595 = vmatprep.subr.bf16.mxu0 %v682_v16 }
  0x19   :  { %450 = vperm.xlu0 %667, %v446_v38  }
  0x1b   :  { %596 = vmatpush3.bf16.msra.mxu0 %v684_v20 }
  0x1c   :  { %597 = vmatprep.subr.bf16.mxu0 %v685_v21  ;;  %649 = vmatmul.mubr.msk.bf16.gmra.mxu1 %vm292_vm0, %v701_v31 }
  0x1d   :  { %660 = vmatprep.mubr.msk.bf16.mxu1 %vm713_vm1, %v712_v43 }
  0x1f   :  { %598 = vmatpush3.bf16.msra.mxu0 %v687_v24 }
  0x22   :  { %338 = vmatmul.mubr.bf16.vlgmr.msra.gmra.mxu0 %v688_v28 }
  0x23   :  { %345 = vmatprep.mubr.bf16.mxu0 %v694_v30 }
  0x2a   :  { %346 = vmatmul.mubr.bf16.gmra.mxu0 %v696_v35 }
  0x2b   :  { %353 = vmatprep.mubr.bf16.mxu0 %v697_v37 }
  0x32   :  { %354 = vmatmul.mubr.bf16.gmra.mxu0 %v699_v40 }
  0x33   :  { %361 = vmatprep.mubr.bf16.mxu0 %v555_v41 }
  0x3a   :  { %362 = vmatmul.mubr.bf16.gmra.mxu0 %v554_v42 }
  0x84   :  { %v115_v59 = vpop.permute.xlu0 %114 }
  0x86   :  { %v110_v1 = vpop.permute.xlu1 %109 }
  0x88   :  { %v105_v63 = vpop.permute.xlu0 %104 }
  0x8a   :  { %v95_v11 = vpop.permute.xlu1 %94 }
  0x8c   :  { %v100_v6 = vpop.permute.xlu0 %99 }
  0x8e   :  { %v85_v26 = vpop.permute.xlu1 %84 }
  0x90   :  { %v90_v21 = vpop.permute.xlu0 %89 }
  0xd4   :  { %v646_v44 = vpop.f32.mrf.mxu1 }
  0xd6   :  { %v403_v45 = vpop.f32.mrf.mxu1 }
  0xd8   :  { %v647_v46 = vpop.f32.mrf.mxu1 }
  0xda   :  { %v406_v48 = vpop.f32.mrf.mxu1 }
  0xdc   :  { %v650_v50 = vpop.f32.mrf.mxu1 }
  0xde   :  { %v419_v52 = vpop.f32.mrf.mxu1 }
  0xe0   :  { %v651_v54 = vpop.f32.mrf.mxu1 }
  0xe2   :  { %v599_v47 = vpop.f32.mrf.mxu0  ;;  %v422_v13 = vpop.f32.mrf.mxu1 }
  0xe4   :  { %v600_v49 = vpop.f32.mrf.mxu0 }
  0xe5   :  { %v601_v23 = vadd.f32 %v600_v49, %v599_v47 }
  0xe6   :  { %v602_v51 = vpop.f32.mrf.mxu0 }
  0xe7   :  { %v340_v32 = vadd.f32 %v601_v23, %v85_v26 }
  0xe8   :  { %v603_v53 = vpop.f32.mrf.mxu0 }
  0xe9   :  { %v604_v18 = vadd.f32 %v603_v53, %v602_v51  ;;  %v404_v38 = vadd.f32 %v403_v45, %v340_v32 }
  0xea   :  { %v605_v55 = vpop.f32.mrf.mxu0 }
  0xeb   :  { %v343_v28 = vadd.f32 %v604_v18, %v90_v21  ;;  %v433_v42 = vmax.f32 %v404_v38, 0.0 }
  0xec   :  { %v606_v56 = vpop.f32.mrf.mxu0 }
  0xed   :  { %v607_v14 = vadd.f32 %v606_v56, %v605_v55  ;;  %v407_v35 = vadd.f32 %v406_v48, %v343_v28  ;;  %v456_v48 = vpop.permute.xlu1 %455 }
  0xee   :  { %v608_v57 = vpop.f32.mrf.mxu0 }
  0xef   :  { %v348_v24 = vadd.f32 %v607_v14, %v95_v11  ;;  %v434_v40 = vmax.f32 %v407_v35, 0.0 }
  0xf0   :  { %v609_v58 = vpop.f32.mrf.mxu0 }
  0xf1   :  { %v610_v8 = vadd.f32 %v609_v58, %v608_v57  ;;  %v412_v33 = vadd.f32 %v646_v44, %v348_v24  ;;  %v704_v44 = vld [vmem:[%s888_s3] sm:$0x1f]  }
  0xf2   :  { %v611_v60 = vpop.f32.mrf.mxu0 }
  0xf3   :  { %v351_v19 = vadd.f32 %v610_v8, %v100_v6  ;;  %v435_v39 = vmax.f32 %v412_v33, 0.0 }
  0xf4   :  { %v612_v61 = vpop.f32.mrf.mxu0 }
  0xf5   :  { %v613_v4 = vadd.f32 %v612_v61, %v611_v60  ;;  %v415_v29 = vadd.f32 %v647_v46, %v351_v19  ;;  %v442_v46 = vpack.c.bf16 %v434_v40, %v433_v42 }
  0xf6   :  { %v614_v62 = vpop.f32.mrf.mxu0 }
  0xf7   :  { %v356_v15 = vadd.f32 %v613_v4, %v105_v63  ;;  %v436_v36 = vmax.f32 %v415_v29, 0.0 }
  0xf8   :  { %v615_v0 = vpop.f32.mrf.mxu0 }
  0xf9   :  { %v616_v2 = vadd.f32 %v615_v0, %v614_v62  ;;  %v420_v25 = vadd.f32 %v419_v52, %v356_v15  ;;  %v443_v41 = vpack.c.bf16 %v436_v36, %v435_v39 }
  0xfa   :  { %v617_v3 = vpop.f32.mrf.mxu0 }
  0xfb   :  { %v359_v9 = vadd.f32 %v616_v2, %v110_v1  ;;  %v437_v34 = vmax.f32 %v420_v25, 0.0 }
  0xfc   :  { %v618_v5 = vpop.f32.mrf.mxu0 }
  0xfd   :  { %v619_v7 = vadd.f32 %v618_v5, %v617_v3  ;;  %v423_v20 = vadd.f32 %v422_v13, %v359_v9 }
  0xfe   :  { %v620_v10 = vpop.f32.mrf.mxu0 }
  0xff   :  { %v364_v12 = vadd.f32 %v619_v7, %v115_v59  ;;  %v438_v30 = vmax.f32 %v423_v20, 0.0 }
 0x100   :  { %v621_v16 = vpop.f32.mrf.mxu0 }
 0x101   :  { %v428_v17 = vadd.f32 %v650_v50, %v364_v12  ;;  %v444_v37 = vpack.c.bf16 %v438_v30, %v437_v34  ;;  %v451_v50 = vpop.permute.xlu0 %450 }
 0x103   :  { %v439_v22 = vmax.f32 %v428_v17, 0.0 }
 0x105   :  { %v445_v27 = vpack.c.bf16 %v439_v22, %v439_v22 }
 0x107   :  { %v469_v31 = vsel %vm467_vm2, %v445_v27, 0 }
 0x108   :  { %653 = vmatpush3.bf16.msra.mxu1 %v469_v31 }
 0x109   :  { %654 = vmatprep.subr.bf16.mxu1 %v712_v43 }
 0x10c   :  { %655 = vmatpush3.bf16.msra.mxu1 %v444_v37 }
 0x10d   :  { %656 = vmatprep.subr.bf16.mxu1 %v712_v43 }
 0x110   :  { %657 = vmatpush3.bf16.msra.mxu1 %v443_v41 }
 0x111   :  { %658 = vmatprep.subr.bf16.mxu1 %v712_v43 }
 0x114   :  { %659 = vmatpush3.bf16.msra.mxu1 %v442_v46 }
 0x117   :  { %661 = vmatmul.mubr.msk.bf16.vlgmr.msra.gmra.mxu1 %vm463_vm3, %v704_v44 }
 0x1d7   :  { %v505_v47 = vpop.f32.mrf.mxu1 }
 0x1d8   :  { %v506_v52 = vadd.f32 %v505_v47, %v451_v50 }
 0x1d9   :  { %v662_v45 = vpop.f32.mrf.mxu1 }
 0x1db   :  { %v508_v49 = vpop.f32.mrf.mxu1 }
 0x1dc   :  { %v509_v51 = vadd.f32 %v508_v49, %v456_v48 }
 0x1dd   :  { %v663_v53 = vpop.f32.mrf.mxu1 }
 0x1de   :  { %v513_v54 = vsel %vm512_vm4, %v509_v51, -inf }
 0x1df   :  { %v514_v43 = vmax.f32 %v506_v52, %v513_v54 }
 0x1e1   :  { %v515_v55 = vrot.slane %v514_v43, 4 }
 0x1e3   :  { %v516_v56 = vmax.f32 %v514_v43, %v515_v55 }
 0x1e5   :  { %v517_v57 = vrot.slane %v516_v56, 2 }
 0x1e7   :  { %v518_v58 = vmax.f32 %v516_v56, %v517_v57 }
 0x1e9   :  { %v519_v59 = vrot.slane %v518_v58, 1 }
 0x1eb   :  { %v520_v60 = vmax.f32 %v518_v58, %v519_v59 }
 0x1ed   :  { %v521_v61 = vsub.f32 %v506_v52, %v520_v60  ;;  %v522_v62 = vsub.f32 %v509_v51, %v520_v60 }
 0x1ef   :  { %v523_v63 = vmul.f32 1.442695, %v521_v61  ;;  %v525_v0 = vmul.f32 1.442695, %v522_v62 }
 0x1f1   :  { %705 = vpow2.f32 %v523_v63 }
 0x1f2   :  { %707 = vpow2.f32 %v525_v0 }
 0x1fe   :  { %v706_v1 = vpop.eup %705 }
 0x1ff   :  { %v708_v2 = vpop.eup %707 }
 0x200   :  { %v527_v3 = vsel %vm512_vm4, %v708_v2, 0.0 }
 0x201   :  { %v528_v4 = vadd.f32 %v706_v1, %v527_v3 }
 0x203   :  { %v529_v5 = vrot.slane %v528_v4, 4 }
 0x205   :  { %v530_v6 = vadd.f32 %v529_v5, %v528_v4 }
 0x207   :  { %v531_v7 = vrot.slane %v530_v6, 2 }
 0x209   :  { %v532_v8 = vadd.f32 %v531_v7, %v530_v6 }
 0x20b   :  { %v533_v9 = vrot.slane %v532_v8, 1 }
 0x20d   :  { %v534_v10 = vadd.f32 %v533_v9, %v532_v8 }
 0x20f   :  { %709 = vlog2.f32 %v534_v10 }
 0x21c   :  { %v710_v11 = vpop.eup %709 }
 0x21d   :  { %v536_v12 = vmul.f32 0.6931472, %v710_v11 }
 0x21f   :  { %v537_v13 = vsub.f32 %v521_v61, %v536_v12  ;;  %v538_v14 = vsub.f32 %v522_v62, %v536_v12 }
 0x221   :  { %539 = vst [vmem:[%s889_s5] sm:$0xff] %v537_v13  ;;  %540 = vst [vmem:[%s889_s5 + $0x8] sm:$0x3] %v538_v14 }

</bundles_post_ra>
